<compile_context>
chip_gen: v7x
topology: tpu7x:2x2x1
jax: 0.10.0
libtpu: 0.0.40
codegen_flags: <defaults>
</compile_context>

<pallas_src>
import functools

import jax
import jax.numpy as jnp
from jax.experimental import pallas as pl
from jax.experimental.pallas import tpu as pltpu

TEMPERATURE = 4.0
ALPHA = 0.5


def _round_up(x, m):
    return (x + m - 1) // m * m


def _vmem_limit_bytes():
    # v5e/v6e: 128 MiB VMEM per TensorCore, v7x: 64 MiB. Stay below physical
    # with headroom while raising the (16/32 MiB) default scoped limits.
    try:
        cap = int(pltpu.get_tpu_info().vmem_capacity_bytes)
    except Exception:  # conservative fallback (v7x-sized)
        cap = 64 * 1024 * 1024
    return min(cap - 16 * 1024 * 1024, 100 * 1024 * 1024)


def _distill_kernel(labels_ref, s_ref, t_ref, out_ref, *,
                    temperature, alpha, batch_size, block_b):
    pid = pl.program_id(0)

    # Cast per tile in VMEM; HBM traffic stays at the native dtype width.
    s = s_ref[...].astype(jnp.float32)        # (TB, C)
    t = t_ref[...].astype(jnp.float32)        # (TB, C)
    lab = labels_ref[...]                     # (TB, 1) int32
    TB, C = s.shape

    inv_t = 1.0 / temperature

    # Row maxes (shared between the hard and tempered terms for the student).
    m_s = jnp.max(s, axis=1, keepdims=True)                        # (TB, 1)
    m_t = jnp.max(t, axis=1, keepdims=True)                        # (TB, 1)
    d_s = s - m_s
    d_t = t - m_t

    # ---- hard CE: lse(s) - s[label], masked select instead of a one-hot ----
    z_s = jnp.sum(jnp.exp(d_s), axis=1, keepdims=True)             # (TB, 1)
    lse_s = m_s + jnp.log(z_s)
    col = jax.lax.broadcasted_iota(jnp.int32, (TB, C), 1)
    picked = jnp.sum(jnp.where(col == lab, s, 0.0), axis=1, keepdims=True)
    hard_row = lse_s - picked                                      # (TB, 1)

    # ---- tempered terms: fold 1/T into exp args, never build sT/tT/p_t ----
    z_sT = jnp.sum(jnp.exp(d_s * inv_t), axis=1, keepdims=True)
    lse_sT = m_s * inv_t + jnp.log(z_sT)                           # (TB, 1)

    e_t = jnp.exp(d_t * inv_t)                                     # (TB, C)
    z_tT = jnp.sum(e_t, axis=1, keepdims=True)
    lse_tT = m_t * inv_t + jnp.log(z_tT)                           # (TB, 1)

    # KL(teacher || student) per row (uses sum p_t == 1):
    #   sum p_t * (tT - sT) + lse_sT - lse_tT
    #     = (inv_t / z_tT) * sum e_t * (t - s) + lse_sT - lse_tT
    cross = jnp.sum(e_t * (t - s), axis=1, keepdims=True)          # (TB, 1)
    # Keep the normalizer reciprocal exact (no approx) for tight tolerances.
    kl_row = cross * (inv_t / z_tT) + lse_sT - lse_tT
    soft_row = kl_row * (temperature * temperature)

    per_row = alpha * soft_row + (1.0 - alpha) * hard_row          # (TB, 1)

    # Mask padded tail rows (global row index >= real batch size). The ragged
    # last block reads undefined rows from HBM; all ops above are row-wise so
    # garbage stays row-contained and is dropped here (and at writeback).
    row = pid * block_b + jax.lax.broadcasted_iota(jnp.int32, (TB, 1), 0)
    out_ref[...] = jnp.where(row < batch_size, per_row, 0.0)


def distillation_loss(student_outputs, teacher_outputs, labels, *,
                      temperature=TEMPERATURE, alpha=ALPHA, block_b=None):
    B, C = student_outputs.shape
    itemsize = max(student_outputs.dtype.itemsize, teacher_outputs.dtype.itemsize)
    sub_mult = {4: 8, 2: 16, 1: 32}.get(itemsize, 8)

    vmem_limit = _vmem_limit_bytes()
    vmem_budget = int(vmem_limit * 0.6)
    # per batch row: 2 inputs x 2 pipeline buffers (native dtype)
    #              + ~8 live (TB, C) f32/i32 temporaries in the body
    bytes_per_row = C * (2 * 2 * itemsize + 8 * 4)
    tb_cap = max(sub_mult, (vmem_budget // max(bytes_per_row, 1)) // sub_mult * sub_mult)
    tb_cap = min(tb_cap, 8192)  # per-step-overhead amortization saturates here

    tb_full = _round_up(B, sub_mult)
    if block_b is None:
        TB = min(tb_full, tb_cap)          # auto: as big a tile as VMEM allows
    else:
        TB = min(_round_up(block_b, sub_mult), tb_full, tb_cap)
    if TB >= B:
        TB = B                             # single full-batch block (always legal)

    num_tiles = pl.cdiv(B, TB)

    # No pad of the logits: grid=cdiv handles the ragged last block.
    labels2d = labels.astype(jnp.int32).reshape(B, 1)

    kernel = functools.partial(
        _distill_kernel,
        temperature=float(temperature),
        alpha=float(alpha),
        batch_size=B,
        block_b=TB,
    )

    bytes_accessed = (student_outputs.size * student_outputs.dtype.itemsize
                      + teacher_outputs.size * teacher_outputs.dtype.itemsize
                      + B * 4 + B * 4)
    cost = pl.CostEstimate(
        flops=12 * B * C,
        transcendentals=3 * B * C,
        bytes_accessed=bytes_accessed,
    )

    per_row = pl.pallas_call(
        kernel,
        out_shape=jax.ShapeDtypeStruct((B, 1), jnp.float32),
        grid_spec=pltpu.PrefetchScalarGridSpec(
            num_scalar_prefetch=0,
            grid=(num_tiles,),
            in_specs=[
                pl.BlockSpec((TB, 1), lambda i: (i, 0)),   # labels
                pl.BlockSpec((TB, C), lambda i: (i, 0)),   # student logits
                pl.BlockSpec((TB, C), lambda i: (i, 0)),   # teacher logits
            ],
            out_specs=pl.BlockSpec((TB, 1), lambda i: (i, 0)),
        ),
        compiler_params=pltpu.CompilerParams(
            dimension_semantics=("parallel",),
            vmem_limit_bytes=vmem_limit,
        ),
        cost_estimate=cost,
    )(labels2d, student_outputs, teacher_outputs)

    return jnp.sum(per_row) / B


def _reference(s, t, labels, temperature=TEMPERATURE, alpha=ALPHA):
    # pure-JAX reference mirroring the PyTorch module
    s = s.astype(jnp.float32)
    t = t.astype(jnp.float32)
    lse = jax.scipy.special.logsumexp(s, axis=1)
    hard = jnp.mean(lse - s[jnp.arange(s.shape[0]), labels])
    ls = jax.nn.log_softmax(s / temperature, axis=1)
    p = jax.nn.softmax(t / temperature, axis=1)
    kl = jnp.sum(p * (jnp.log(p) - ls)) / s.shape[0]
    soft = kl * temperature ** 2
    return alpha * soft + (1 - alpha) * hard


if __name__ == "__main__":
    key = jax.random.PRNGKey(0)
    k1, k2, k3, k4, k5, k6 = jax.random.split(key, 6)

    # Test 1: small f32 logits, single tile (B=8, classes=16).
    B, C = 8, 16
    student = jax.random.normal(k1, (B, C), dtype=jnp.float32)
    teacher = jax.random.normal(k2, (B, C), dtype=jnp.float32)
    labels = jax.random.randint(k3, (B,), 0, C, dtype=jnp.int32)
    loss = distillation_loss(student, teacher, labels)
    jax.block_until_ready(loss)
    ref = _reference(student, teacher, labels)
    assert jnp.allclose(loss, ref, rtol=1e-4, atol=1e-5), (loss, ref)

    # Test 2: bf16 logits (native dtype kept in HBM), forced small tile ->
    # multi-tile grid with a ragged, unpadded last block (B=20, TB=16).
    B2, C2 = 20, 40
    student2 = jax.random.normal(k4, (B2, C2), dtype=jnp.float32).astype(jnp.bfloat16)
    teacher2 = jax.random.normal(k5, (B2, C2), dtype=jnp.float32).astype(jnp.bfloat16)
    labels2 = jax.random.randint(k6, (B2,), 0, C2, dtype=jnp.int32)
    loss2 = distillation_loss(student2, teacher2, labels2, block_b=16)
    jax.block_until_ready(loss2)
    ref2 = _reference(student2, teacher2, labels2)
    assert jnp.allclose(loss2, ref2, rtol=1e-4, atol=1e-4), (loss2, ref2)

    # Test 3: same data through the default (auto, big-tile) path -> one
    # full-batch block, no padding anywhere.
    loss3 = distillation_loss(student2, teacher2, labels2)
    jax.block_until_ready(loss3)
    assert jnp.allclose(loss3, ref2, rtol=1e-4, atol=1e-4), (loss3, ref2)

    print("KERNEL_OK")
</pallas_src>

<mosaic_0001>
module attributes {stable_mosaic.version = 11 : i64} {
  func.func @_distill_kernel(%arg0: i32, %arg1: memref<8x1xi32, #tpu.memory_space<vmem>>, %arg2: memref<8x16xf32, #tpu.memory_space<vmem>>, %arg3: memref<8x16xf32, #tpu.memory_space<vmem>>, %arg4: memref<8x1xf32, #tpu.memory_space<vmem>>) attributes {dimension_semantics = [#tpu.dimension_semantics<parallel>], iteration_bounds = array<i64: 1>, scalar_prefetch = 0 : i64, scratch_operands = 0 : i64, tpu.core_type = #tpu.core_type<tc>, window_params = [{transform_indices = @transform_0, window_bounds = array<i64: 8, 1>}, {transform_indices = @transform_1, window_bounds = array<i64: 8, 16>}, {transform_indices = @transform_2, window_bounds = array<i64: 8, 16>}, {transform_indices = @transform_3, window_bounds = array<i64: 8, 1>}]} {
    %c0 = arith.constant 0 : index
    %c0_0 = arith.constant 0 : index
    %0 = vector.load %arg2[%c0, %c0_0] : memref<8x16xf32, #tpu.memory_space<vmem>>, vector<8x16xf32>
    %c0_1 = arith.constant 0 : index
    %c0_2 = arith.constant 0 : index
    %1 = vector.load %arg3[%c0_1, %c0_2] : memref<8x16xf32, #tpu.memory_space<vmem>>, vector<8x16xf32>
    %c0_3 = arith.constant 0 : index
    %c0_4 = arith.constant 0 : index
    %2 = vector.load %arg1[%c0_3, %c0_4] : memref<8x1xi32, #tpu.memory_space<vmem>>, vector<8x1xi32>
    %cst = arith.constant dense<0xFF800000> : vector<8xf32>
    %3 = vector.multi_reduction <maximumf>, %0, %cst [1] : vector<8x16xf32> to vector<8xf32>
    %4 = vector.shape_cast %3 : vector<8xf32> to vector<8x1xf32>
    %cst_5 = arith.constant dense<0xFF800000> : vector<8xf32>
    %5 = vector.multi_reduction <maximumf>, %1, %cst_5 [1] : vector<8x16xf32> to vector<8xf32>
    %6 = vector.shape_cast %5 : vector<8xf32> to vector<8x1xf32>
    %7 = vector.broadcast %4 : vector<8x1xf32> to vector<8x16xf32>
    %8 = arith.subf %0, %7 : vector<8x16xf32>
    %9 = vector.broadcast %6 : vector<8x1xf32> to vector<8x16xf32>
    %10 = arith.subf %1, %9 : vector<8x16xf32>
    %11 = math.exp %8 : vector<8x16xf32>
    %cst_6 = arith.constant dense<0.000000e+00> : vector<8xf32>
    %12 = vector.multi_reduction <add>, %11, %cst_6 [1] : vector<8x16xf32> to vector<8xf32>
    %13 = vector.shape_cast %12 : vector<8xf32> to vector<8x1xf32>
    %14 = math.log %13 : vector<8x1xf32>
    %15 = arith.addf %4, %14 : vector<8x1xf32>
    %16 = tpu.iota {dimensions = array<i32: 1>} : vector<8x16xi32>
    %17 = vector.broadcast %2 : vector<8x1xi32> to vector<8x16xi32>
    %18 = arith.cmpi eq, %16, %17 : vector<8x16xi32>
    %cst_7 = arith.constant 0.000000e+00 : f32
    %19 = vector.broadcast %cst_7 : f32 to vector<8x16xf32>
    %20 = arith.select %18, %0, %19 : vector<8x16xi1>, vector<8x16xf32>
    %cst_8 = arith.constant dense<0.000000e+00> : vector<8xf32>
    %21 = vector.multi_reduction <add>, %20, %cst_8 [1] : vector<8x16xf32> to vector<8xf32>
    %22 = vector.shape_cast %21 : vector<8xf32> to vector<8x1xf32>
    %23 = arith.subf %15, %22 : vector<8x1xf32>
    %cst_9 = arith.constant 2.500000e-01 : f32
    %24 = vector.broadcast %cst_9 : f32 to vector<8x16xf32>
    %25 = arith.mulf %8, %24 : vector<8x16xf32>
    %26 = math.exp %25 : vector<8x16xf32>
    %cst_10 = arith.constant dense<0.000000e+00> : vector<8xf32>
    %27 = vector.multi_reduction <add>, %26, %cst_10 [1] : vector<8x16xf32> to vector<8xf32>
    %28 = vector.shape_cast %27 : vector<8xf32> to vector<8x1xf32>
    %cst_11 = arith.constant 2.500000e-01 : f32
    %29 = vector.broadcast %cst_11 : f32 to vector<8x1xf32>
    %30 = arith.mulf %4, %29 : vector<8x1xf32>
    %31 = math.log %28 : vector<8x1xf32>
    %32 = arith.addf %30, %31 : vector<8x1xf32>
    %cst_12 = arith.constant 2.500000e-01 : f32
    %33 = vector.broadcast %cst_12 : f32 to vector<8x16xf32>
    %34 = arith.mulf %10, %33 : vector<8x16xf32>
    %35 = math.exp %34 : vector<8x16xf32>
    %cst_13 = arith.constant dense<0.000000e+00> : vector<8xf32>
    %36 = vector.multi_reduction <add>, %35, %cst_13 [1] : vector<8x16xf32> to vector<8xf32>
    %37 = vector.shape_cast %36 : vector<8xf32> to vector<8x1xf32>
    %cst_14 = arith.constant 2.500000e-01 : f32
    %38 = vector.broadcast %cst_14 : f32 to vector<8x1xf32>
    %39 = arith.mulf %6, %38 : vector<8x1xf32>
    %40 = math.log %37 : vector<8x1xf32>
    %41 = arith.addf %39, %40 : vector<8x1xf32>
    %42 = arith.subf %1, %0 : vector<8x16xf32>
    %43 = arith.mulf %35, %42 : vector<8x16xf32>
    %cst_15 = arith.constant dense<0.000000e+00> : vector<8xf32>
    %44 = vector.multi_reduction <add>, %43, %cst_15 [1] : vector<8x16xf32> to vector<8xf32>
    %45 = vector.shape_cast %44 : vector<8xf32> to vector<8x1xf32>
    %cst_16 = arith.constant 2.500000e-01 : f32
    %46 = vector.broadcast %cst_16 : f32 to vector<8x1xf32>
    %47 = arith.divf %46, %37 : vector<8x1xf32>
    %48 = arith.mulf %45, %47 : vector<8x1xf32>
    %49 = arith.addf %48, %32 : vector<8x1xf32>
    %50 = arith.subf %49, %41 : vector<8x1xf32>
    %cst_17 = arith.constant 1.600000e+01 : f32
    %51 = vector.broadcast %cst_17 : f32 to vector<8x1xf32>
    %52 = arith.mulf %50, %51 : vector<8x1xf32>
    %cst_18 = arith.constant 5.000000e-01 : f32
    %53 = vector.broadcast %cst_18 : f32 to vector<8x1xf32>
    %54 = arith.mulf %53, %52 : vector<8x1xf32>
    %cst_19 = arith.constant 5.000000e-01 : f32
    %55 = vector.broadcast %cst_19 : f32 to vector<8x1xf32>
    %56 = arith.mulf %55, %23 : vector<8x1xf32>
    %57 = arith.addf %54, %56 : vector<8x1xf32>
    %c8_i32 = arith.constant 8 : i32
    %58 = arith.muli %arg0, %c8_i32 : i32
    %59 = tpu.iota {dimensions = array<i32: 0>} : vector<8x1xi32>
    %60 = vector.broadcast %58 : i32 to vector<8x1xi32>
    %61 = arith.addi %60, %59 : vector<8x1xi32>
    %c8_i32_20 = arith.constant 8 : i32
    %62 = vector.broadcast %c8_i32_20 : i32 to vector<8x1xi32>
    %63 = arith.cmpi slt, %61, %62 : vector<8x1xi32>
    %cst_21 = arith.constant 0.000000e+00 : f32
    %64 = vector.broadcast %cst_21 : f32 to vector<8x1xf32>
    %65 = arith.select %63, %57, %64 : vector<8x1xi1>, vector<8x1xf32>
    %c0_22 = arith.constant 0 : index
    %c0_23 = arith.constant 0 : index
    %66 = vector.load %arg4[%c0_22, %c0_23] : memref<8x1xf32, #tpu.memory_space<vmem>>, vector<8x1xf32>
    tpu.vector_store %arg4[%c0_22, %c0_23], %65 {strides = array<i32>} : memref<8x1xf32, #tpu.memory_space<vmem>>, vector<8x1xf32>,
    return
  }
  func.func @transform_0(%arg0: i32) -> (i32, i32) {
    %c0_i32 = arith.constant 0 : i32
    %c0_i32_0 = arith.constant 0 : i32
    return %arg0, %c0_i32 : i32, i32
  }
  func.func @transform_1(%arg0: i32) -> (i32, i32) {
    %c0_i32 = arith.constant 0 : i32
    %c0_i32_0 = arith.constant 0 : i32
    return %arg0, %c0_i32 : i32, i32
  }
  func.func @transform_2(%arg0: i32) -> (i32, i32) {
    %c0_i32 = arith.constant 0 : i32
    %c0_i32_0 = arith.constant 0 : i32
    return %arg0, %c0_i32 : i32, i32
  }
  func.func @transform_3(%arg0: i32) -> (i32, i32) {
    %c0_i32 = arith.constant 0 : i32
    %c0_i32_0 = arith.constant 0 : i32
    return %arg0, %c0_i32 : i32, i32
  }
}

</mosaic_0001>

<bundles_post_ra>
// kernel: tpu_custom_call.1
= control target key start
LH: loop header
LB: loop body
LE: loop exit
PB: predicated region body
PF: predicated region fallthrough
CT: control target
= control target key end

     0   :  { %vm17_vm0 = vcmask 130048   ;;  %v109_v2 = vmov 0   ;;  %v34_v17 = vlaneseq  ;;  %vm86_vm2 = vcmask 7168   ;;  %s149_s1 = inlined_call_operand.vmem [shape: f32[8,16], index: 1, kind: input, shape index: {}]   ;;  %s150_s2 = inlined_call_operand.vmem [shape: f32[8,16], index: 2, kind: input, shape index: {}]   ;;  %s151_s0 = inlined_call_operand.vmem [shape: s32[8,1], index: 0, kind: input, shape index: {}]   ;;  %s152_s3 = inlined_call_operand.vmem [shape: f32[8,1], index: 3, kind: output, shape index: {}]  }
   0x1   :  { %v14_v0 = vld [vmem:[%s149_s1] sm:$0xff]  ;;  %93 = vset.pattern.permute.xlu1 %v109_v2  ;;  %94 = vset.pattern.permute.xlu0 %v109_v2 }
   0x2   :  { %v15_v1 = vld [vmem:[%s150_s2] sm:$0xff]  ;;  %v18_v4 = vsel %vm17_vm0, %v14_v0, -inf  ;;  %v35_v21 = vand.u32 127, %v34_v17 }
   0x3   :  { %v16_v3 = vld [vmem:[%s151_s0] sm:$0xff]  ;;  %19 = vmax.xlane.f32.xlu0 %v18_v4  ;;  %v21_v5 = vsel %vm17_vm0, %v15_v1, -inf  ;;  %v65_v20 = vsub.f32 %v15_v1, %v14_v0 }
   0x4   :  { %37 = vperm.xlu1 %93, %v16_v3  }
   0x7   :  { %22 = vmax.xlane.f32.xlu0 %v21_v5 }
  0x83   :  { %v38_v23 = vpop.permute.xlu1 %37 }
  0x84   :  { %vm39_vm1 = vcmp.eq.s32.totalorder %v35_v21, %v38_v23 }
  0x85   :  { %v40_v26 = vsel %vm39_vm1, %v14_v0, 0.0 }
  0x86   :  { %v41_v28 = vsel %vm17_vm0, %v40_v26, 0.0 }
  0x90   :  { %v20_v6 = vpop.xlane.xlu0 %19 }
  0x91   :  { %v24_v7 = vsub.f32 %v14_v0, %v20_v6  ;;  %v51_v36 = vmul.f32 0.25, %v20_v6 }
  0x93   :  { %v45_v8 = vmul.f32 0.25, %v24_v7  ;;  %v26_v13 = vmul.f32 1.442695, %v24_v7 }
  0x94   :  { %v23_v9 = vpop.xlane.xlu0 %22 }
  0x95   :  { %v46_v10 = vmul.f32 1.442695, %v45_v8  ;;  %v25_v11 = vsub.f32 %v15_v1, %v23_v9  ;;  %v61_v41 = vmul.f32 0.25, %v23_v9 }
  0x97   :  { %95 = vpow2.f32 %v46_v10  ;;  %v55_v12 = vmul.f32 0.25, %v25_v11 }
  0x99   :  { %v56_v14 = vmul.f32 1.442695, %v55_v12 }
  0x9b   :  { %97 = vpow2.f32 %v56_v14 }
  0x9c   :  { %99 = vpow2.f32 %v26_v13 }
  0xa1   :  { %v96_v15 = vpop.eup %95 }
  0xa2   :  { %v48_v16 = vsel %vm17_vm0, %v96_v15, 0.0 }
  0xa3   :  { %49 = vadd.xlane.f32.xlu1 %v48_v16 }
  0xa5   :  { %v98_v18 = vpop.eup %97 }
  0xa6   :  { %v58_v19 = vsel %vm17_vm0, %v98_v18, 0.0  ;;  %v100_v22 = vpop.eup %99  ;;  %v66_v25 = vmul.f32 %v98_v18, %v65_v20 }
  0xa7   :  { %59 = vadd.xlane.f32.xlu0 %v58_v19  ;;  %v28_v24 = vsel %vm17_vm0, %v100_v22, 0.0 }
  0xa8   :  { %v67_v27 = vsel %vm17_vm0, %v66_v25, 0.0 }
  0xab   :  { %29 = vadd.xlane.f32.xlu0 %v28_v24 }
  0xaf   :  { %68 = vadd.xlane.f32.xlu0 %v67_v27 }
  0xb3   :  { %42 = vadd.xlane.f32.xlu0 %v41_v28 }
 0x130   :  { %v50_v29 = vpop.xlane.xlu1 %49 }
 0x131   :  { %101 = vlog2.f32 %v50_v29 }
 0x134   :  { %v60_v30 = vpop.xlane.xlu0 %59 }
 0x135   :  { %103 = vlog2.f32 %v60_v30 }
 0x136   :  { %105 = vrcp.f32 %v60_v30 }
 0x138   :  { %v30_v31 = vpop.xlane.xlu0 %29 }
 0x139   :  { %107 = vlog2.f32 %v30_v31 }
 0x13b   :  { %v102_v32 = vpop.eup %101 }
 0x13c   :  { %v53_v34 = vmul.f32 0.6931472, %v102_v32  ;;  %v69_v39 = vpop.xlane.xlu0 %68 }
 0x13e   :  { %v54_v42 = vadd.f32 %v53_v34, %v51_v36 }
 0x13f   :  { %v104_v33 = vpop.eup %103 }
 0x140   :  { %v106_v35 = vpop.eup %105  ;;  %v63_v37 = vmul.f32 0.6931472, %v104_v33  ;;  %v43_v47 = vpop.xlane.xlu0 %42 }
 0x141   :  { %v71_v38 = vmul.f32 0.25, %v106_v35 }
 0x142   :  { %v64_v45 = vadd.f32 %v63_v37, %v61_v41 }
 0x143   :  { %v108_v40 = vpop.eup %107  ;;  %v72_v43 = vmul.f32 %v71_v38, %v69_v39 }
 0x144   :  { %v32_v44 = vmul.f32 0.6931472, %v108_v40 }
 0x145   :  { %v73_v46 = vadd.f32 %v72_v43, %v54_v42 }
 0x146   :  { %v33_v48 = vadd.f32 %v32_v44, %v20_v6 }
 0x147   :  { %v74_v49 = vsub.f32 %v73_v46, %v64_v45 }
 0x148   :  { %v44_v50 = vsub.f32 %v33_v48, %v43_v47 }
 0x149   :  { %v75_v51 = vmul.f32 16.0, %v74_v49 }
 0x14a   :  { %v77_v52 = vmul.f32 0.5, %v44_v50 }
 0x14b   :  { %v76_v53 = vmul.f32 0.5, %v75_v51 }
 0x14d   :  { %v78_v54 = vadd.f32 %v77_v52, %v76_v53 }
 0x14f   :  { %87 = vst.msk [vmem:[%s152_s3] sm:$0xff] %vm86_vm2, %v78_v54 }

</bundles_post_ra>
